<compile_context>
chip_gen: v5e
topology: v5e:2x2
jax: 0.10.0
libtpu: 0.0.40
codegen_flags: <defaults>
</compile_context>

<pallas_src>
import functools
import math

import jax
import jax.numpy as jnp
from jax import lax
from jax.experimental import pallas as pl
from jax.experimental.pallas import tpu as pltpu


PAD_N = 128  # lane-dense packed head-output width (one full vreg of lanes)


# ------------------------------ fused kernel -------------------------------

def _boner_fused_kernel(x_ref, pos_ref, pw_ref, pb_ref, qe_ref,
                        clsw_ref, clsb_ref,
                        w1_ref, b1_ref, w2_ref, b2_ref, w3_ref, b3_ref,
                        out_ref, *, num_dec_layers, num_cls_cols):
    """One batch element per grid step; everything stays in VMEM/vregs."""
    bf16 = jnp.bfloat16
    f32 = jnp.float32

    # ---- input_proj (Conv1d kernel_size=1): (S, C) @ (C, D) + b, then + pos
    x = x_ref[0].astype(bf16)                                   # (S, C)
    mem = jnp.dot(x, pw_ref[...], preferred_element_type=f32) + pb_ref[...]
    mem = mem + pos_ref[...]                                    # (S, D) f32
    mem_bf = mem.astype(bf16)

    D = mem.shape[-1]
    inv_sqrt_d = 1.0 / math.sqrt(D)

    # ---- decoder stand-in: stacked cross-attention + residual layers
    # TODO(synk): `transformer` is a constructor-injected external module
    # (transformer.py); stand-in = num_dec_layers cross-attention layers.
    def layer(_, q):
        # q . mem^T via dot_general contracting both on D (no transpose copy).
        s = lax.dot_general(q.astype(bf16), mem_bf,
                            dimension_numbers=(((1,), (1,)), ((), ())),
                            preferred_element_type=f32) * inv_sqrt_d   # (Q, S)
        s = s - jnp.max(s, axis=-1, keepdims=True)
        p = jnp.exp(s)
        p = p * pl.reciprocal(jnp.sum(p, axis=-1, keepdims=True), approx=True)
        return q + jnp.dot(p.astype(bf16), mem_bf, preferred_element_type=f32)

    q = lax.fori_loop(0, num_dec_layers, layer,
                      qe_ref[...].astype(f32), unroll=True)     # (Q, D) = hs[-1]

    # ---- heads on hs[-1] only ----
    q_bf = q.astype(bf16)

    # class_embed (weights pre-padded to PAD_N lanes in the wrapper)
    logits = jnp.dot(q_bf, clsw_ref[...],
                     preferred_element_type=f32) + clsb_ref[...]        # (Q, PAD_N)

    # bbox_embed MLP (3 linears, relu on first two) + sigmoid, padded to PAD_N
    h = jnp.maximum(jnp.dot(q_bf, w1_ref[...],
                            preferred_element_type=f32) + b1_ref[...], 0.0)
    h = jnp.maximum(jnp.dot(h.astype(bf16), w2_ref[...],
                            preferred_element_type=f32) + b2_ref[...], 0.0)
    coords = jax.nn.sigmoid(jnp.dot(h.astype(bf16), w3_ref[...],
                                    preferred_element_type=f32) + b3_ref[...])  # (Q, PAD_N)

    # Pack: lanes [0:num_cls_cols] = logits, [num_cls_cols:num_cls_cols+2] = boxes.
    lane = lax.broadcasted_iota(jnp.int32, logits.shape, 1)
    out_ref[0] = jnp.where(lane < num_cls_cols, logits, coords).astype(out_ref.dtype)


# ----------------------------- glue / parameters ---------------------------

def sinusoidal_pos(seq_len, d_model):
    pos = jnp.arange(seq_len, dtype=jnp.float32)[:, None]
    i = jnp.arange(d_model, dtype=jnp.float32)[None, :]
    angle = pos / jnp.power(10000.0, (2.0 * jnp.floor(i / 2.0)) / d_model)
    return jnp.where((i % 2.0) == 0.0, jnp.sin(angle), jnp.cos(angle))


def init_params(key, num_channels=4, hidden_dim=32, num_classes=3,
                num_queries=8, num_dec_layers=2):
    ks = jax.random.split(key, 10)

    def w(k, shape, scale=0.1):
        return scale * jax.random.normal(k, shape, jnp.float32)

    return {
        "hidden_dim": hidden_dim,
        "num_dec_layers": num_dec_layers,
        # input_proj: Conv1d(num_channels, hidden_dim, kernel_size=1) -> (C, hidden)
        "proj_w": w(ks[0], (num_channels, hidden_dim)),
        "proj_b": w(ks[1], (hidden_dim,)),
        # query_embed: nn.Embedding(num_queries, hidden_dim).weight
        "query_embed": w(ks[2], (num_queries, hidden_dim)),
        # class_embed: nn.Linear(hidden_dim, num_classes + 1) -> (hidden, ncls+1)
        "cls_w": w(ks[3], (hidden_dim, num_classes + 1)),
        "cls_b": w(ks[4], (num_classes + 1,)),
        # bbox_embed: MLP(hidden, hidden, 2, 3)
        "mlp_w1": w(ks[5], (hidden_dim, hidden_dim)),
        "mlp_b1": w(ks[6], (hidden_dim,)),
        "mlp_w2": w(ks[7], (hidden_dim, hidden_dim)),
        "mlp_b2": w(ks[8], (hidden_dim,)),
        "mlp_w3": w(ks[9], (hidden_dim, 2)),
        "mlp_b3": jnp.zeros((2,), jnp.float32),
    }


def boner_forward(params, samples):
    """samples: (B, C, S) float32, matching PyTorch's [batch x C x S]."""
    B, C, S = samples.shape
    D = params["hidden_dim"]
    Q = params["query_embed"].shape[0]
    ncls1 = params["cls_w"].shape[1]
    L = params["num_dec_layers"]
    bf16 = jnp.bfloat16

    # TODO(synk): `backbone` is a constructor-injected external module
    # (backbone.py); stand-in = identity features + sinusoidal positional enc.
    pos = sinusoidal_pos(S, D)                                  # (S, D)
    x = jnp.transpose(samples, (0, 2, 1))                       # (B, S, C)

    # Pad both heads' output dims into one lane-dense PAD_N-wide slab:
    #   columns [0:ncls1]        -> class logits
    #   columns [ncls1:ncls1+2]  -> bbox coords (pre-sigmoid)
    cls_w_pad = jnp.zeros((D, PAD_N), jnp.float32).at[:, :ncls1].set(params["cls_w"])
    cls_b_pad = jnp.zeros((1, PAD_N), jnp.float32).at[:, :ncls1].set(params["cls_b"])
    w3_pad = jnp.zeros((D, PAD_N), jnp.float32).at[:, ncls1:ncls1 + 2].set(params["mlp_w3"])
    b3_pad = jnp.zeros((1, PAD_N), jnp.float32).at[:, ncls1:ncls1 + 2].set(params["mlp_b3"])

    kernel = functools.partial(_boner_fused_kernel,
                               num_dec_layers=L, num_cls_cols=ncls1)

    packed = pl.pallas_call(
        kernel,
        out_shape=jax.ShapeDtypeStruct((B, Q, PAD_N), jnp.float32),
        grid=(B,),
        in_specs=[
            pl.BlockSpec((1, S, C), lambda b: (b, 0, 0)),        # samples (chan-last)
            pl.BlockSpec((S, D), lambda b: (0, 0)),              # pos (resident)
            pl.BlockSpec((C, D), lambda b: (0, 0)),              # proj_w (bf16)
            pl.BlockSpec((1, D), lambda b: (0, 0)),              # proj_b
            pl.BlockSpec((Q, D), lambda b: (0, 0)),              # query_embed
            pl.BlockSpec((D, PAD_N), lambda b: (0, 0)),          # cls_w (padded, bf16)
            pl.BlockSpec((1, PAD_N), lambda b: (0, 0)),          # cls_b (padded)
            pl.BlockSpec((D, D), lambda b: (0, 0)),              # mlp_w1 (bf16)
            pl.BlockSpec((1, D), lambda b: (0, 0)),              # mlp_b1
            pl.BlockSpec((D, D), lambda b: (0, 0)),              # mlp_w2 (bf16)
            pl.BlockSpec((1, D), lambda b: (0, 0)),              # mlp_b2
            pl.BlockSpec((D, PAD_N), lambda b: (0, 0)),          # mlp_w3 (padded, bf16)
            pl.BlockSpec((1, PAD_N), lambda b: (0, 0)),          # mlp_b3 (padded)
        ],
        out_specs=pl.BlockSpec((1, Q, PAD_N), lambda b: (b, 0, 0)),
        compiler_params=pltpu.CompilerParams(
            dimension_semantics=("parallel",)),
    )(
        x,
        pos,
        params["proj_w"].astype(bf16),
        params["proj_b"].reshape(1, D),
        params["query_embed"],
        cls_w_pad.astype(bf16), cls_b_pad,
        params["mlp_w1"].astype(bf16), params["mlp_b1"].reshape(1, D),
        params["mlp_w2"].astype(bf16), params["mlp_b2"].reshape(1, D),
        w3_pad.astype(bf16), b3_pad,
    )

    return {"pred_logits": packed[:, :, :ncls1],
            "pred_boxes": packed[:, :, ncls1:ncls1 + 2]}


if __name__ == "__main__":
    key = jax.random.PRNGKey(0)
    pkey, xkey = jax.random.split(key)

    B, C, S = 2, 4, 16
    num_classes, num_queries, hidden = 3, 8, 32

    params = init_params(pkey, num_channels=C, hidden_dim=hidden,
                         num_classes=num_classes, num_queries=num_queries,
                         num_dec_layers=2)
    samples = jax.random.normal(xkey, (B, C, S), jnp.float32)

    out = boner_forward(params, samples)
    jax.block_until_ready(out)

    assert out["pred_logits"].shape == (B, num_queries, num_classes + 1)
    assert out["pred_boxes"].shape == (B, num_queries, 2)
    assert bool(jnp.all((out["pred_boxes"] >= 0.0) & (out["pred_boxes"] <= 1.0)))
    assert bool(jnp.all(jnp.isfinite(out["pred_logits"])))
    print("KERNEL_OK")
</pallas_src>

<mosaic_0001>
module attributes {stable_mosaic.version = 11 : i64} {
  func.func @_boner_fused_kernel(%arg0: i32, %arg1: memref<1x16x4xf32, #tpu.memory_space<vmem>>, %arg2: memref<16x32xf32, #tpu.memory_space<vmem>>, %arg3: memref<4x32xbf16, #tpu.memory_space<vmem>>, %arg4: memref<1x32xf32, #tpu.memory_space<vmem>>, %arg5: memref<8x32xf32, #tpu.memory_space<vmem>>, %arg6: memref<32x128xbf16, #tpu.memory_space<vmem>>, %arg7: memref<1x128xf32, #tpu.memory_space<vmem>>, %arg8: memref<32x32xbf16, #tpu.memory_space<vmem>>, %arg9: memref<1x32xf32, #tpu.memory_space<vmem>>, %arg10: memref<32x32xbf16, #tpu.memory_space<vmem>>, %arg11: memref<1x32xf32, #tpu.memory_space<vmem>>, %arg12: memref<32x128xbf16, #tpu.memory_space<vmem>>, %arg13: memref<1x128xf32, #tpu.memory_space<vmem>>, %arg14: memref<1x8x128xf32, #tpu.memory_space<vmem>>) attributes {dimension_semantics = [#tpu.dimension_semantics<parallel>], iteration_bounds = array<i64: 2>, scalar_prefetch = 0 : i64, scratch_operands = 0 : i64, tpu.core_type = #tpu.core_type<tc>, window_params = [{transform_indices = @transform_0, window_bounds = array<i64: 1, 16, 4>}, {pipeline_mode = #tpu.pipeline_mode<synchronous>, transform_indices = @transform_1, window_bounds = array<i64: 16, 32>}, {pipeline_mode = #tpu.pipeline_mode<synchronous>, transform_indices = @transform_2, window_bounds = array<i64: 4, 32>}, {pipeline_mode = #tpu.pipeline_mode<synchronous>, transform_indices = @transform_3, window_bounds = array<i64: 1, 32>}, {pipeline_mode = #tpu.pipeline_mode<synchronous>, transform_indices = @transform_4, window_bounds = array<i64: 8, 32>}, {pipeline_mode = #tpu.pipeline_mode<synchronous>, transform_indices = @transform_5, window_bounds = array<i64: 32, 128>}, {pipeline_mode = #tpu.pipeline_mode<synchronous>, transform_indices = @transform_6, window_bounds = array<i64: 1, 128>}, {pipeline_mode = #tpu.pipeline_mode<synchronous>, transform_indices = @transform_7, window_bounds = array<i64: 32, 32>}, {pipeline_mode = #tpu.pipeline_mode<synchronous>, transform_indices = @transform_8, window_bounds = array<i64: 1, 32>}, {pipeline_mode = #tpu.pipeline_mode<synchronous>, transform_indices = @transform_9, window_bounds = array<i64: 32, 32>}, {pipeline_mode = #tpu.pipeline_mode<synchronous>, transform_indices = @transform_10, window_bounds = array<i64: 1, 32>}, {pipeline_mode = #tpu.pipeline_mode<synchronous>, transform_indices = @transform_11, window_bounds = array<i64: 32, 128>}, {pipeline_mode = #tpu.pipeline_mode<synchronous>, transform_indices = @transform_12, window_bounds = array<i64: 1, 128>}, {transform_indices = @transform_13, window_bounds = array<i64: 1, 8, 128>}]} {
    %c0 = arith.constant 0 : index
    %c0_0 = arith.constant 0 : index
    %c0_1 = arith.constant 0 : index
    %0 = vector.load %arg1[%c0, %c0_0, %c0_1] : memref<1x16x4xf32, #tpu.memory_space<vmem>>, vector<1x16x4xf32>
    %1 = vector.shape_cast %0 : vector<1x16x4xf32> to vector<16x4xf32>
    %2 = arith.truncf %1 : vector<16x4xf32> to vector<16x4xbf16>
    %c0_2 = arith.constant 0 : index
    %c0_3 = arith.constant 0 : index
    %3 = vector.load %arg3[%c0_2, %c0_3] : memref<4x32xbf16, #tpu.memory_space<vmem>>, vector<4x32xbf16>
    %cst = arith.constant dense<0.000000e+00> : vector<16x32xf32>
    %4 = tpu.matmul %2, %3, %cst {dimension_numbers = #tpu.dot_dimension_numbers<[1], [0], [0], [1], [0, 0, 1, 1], [], []>} : vector<16x4xbf16>, vector<4x32xbf16>, vector<16x32xf32> -> vector<16x32xf32>
    %c0_4 = arith.constant 0 : index
    %c0_5 = arith.constant 0 : index
    %5 = vector.load %arg4[%c0_4, %c0_5] : memref<1x32xf32, #tpu.memory_space<vmem>>, vector<1x32xf32>
    %6 = vector.broadcast %5 : vector<1x32xf32> to vector<16x32xf32>
    %7 = arith.addf %4, %6 : vector<16x32xf32>
    %c0_6 = arith.constant 0 : index
    %c0_7 = arith.constant 0 : index
    %8 = vector.load %arg2[%c0_6, %c0_7] : memref<16x32xf32, #tpu.memory_space<vmem>>, vector<16x32xf32>
    %9 = arith.addf %7, %8 : vector<16x32xf32>
    %10 = arith.truncf %9 : vector<16x32xf32> to vector<16x32xbf16>
    %c0_8 = arith.constant 0 : index
    %c0_9 = arith.constant 0 : index
    %11 = vector.load %arg5[%c0_8, %c0_9] : memref<8x32xf32, #tpu.memory_space<vmem>>, vector<8x32xf32>
    %c0_i32 = arith.constant 0 : i32
    %12 = arith.truncf %11 : vector<8x32xf32> to vector<8x32xbf16>
    %cst_10 = arith.constant dense<0.000000e+00> : vector<8x16xf32>
    %13 = tpu.matmul %12, %10, %cst_10 {dimension_numbers = #tpu.dot_dimension_numbers<[1], [1], [0], [0], [0, 0, 1, 0], [], []>} : vector<8x32xbf16>, vector<16x32xbf16>, vector<8x16xf32> -> vector<8x16xf32>
    %cst_11 = arith.constant 0.176776692 : f32
    %14 = vector.broadcast %cst_11 : f32 to vector<8x16xf32>
    %15 = arith.mulf %13, %14 : vector<8x16xf32>
    %cst_12 = arith.constant dense<0xFF800000> : vector<8xf32>
    %16 = vector.multi_reduction <maximumf>, %15, %cst_12 [1] : vector<8x16xf32> to vector<8xf32>
    %17 = vector.shape_cast %16 : vector<8xf32> to vector<8x1xf32>
    %18 = vector.broadcast %17 : vector<8x1xf32> to vector<8x16xf32>
    %19 = arith.subf %15, %18 : vector<8x16xf32>
    %20 = math.exp %19 : vector<8x16xf32>
    %cst_13 = arith.constant dense<0.000000e+00> : vector<8xf32>
    %21 = vector.multi_reduction <add>, %20, %cst_13 [1] : vector<8x16xf32> to vector<8xf32>
    %22 = vector.shape_cast %21 : vector<8xf32> to vector<8x1xf32>
    %23 = tpu.reciprocal %22 {approx = true} : vector<8x1xf32> -> vector<8x1xf32>
    %24 = vector.broadcast %23 : vector<8x1xf32> to vector<8x16xf32>
    %25 = arith.mulf %20, %24 : vector<8x16xf32>
    %26 = arith.truncf %25 : vector<8x16xf32> to vector<8x16xbf16>
    %cst_14 = arith.constant dense<0.000000e+00> : vector<8x32xf32>
    %27 = tpu.matmul %26, %10, %cst_14 {dimension_numbers = #tpu.dot_dimension_numbers<[1], [0], [0], [1], [0, 0, 1, 1], [], []>} : vector<8x16xbf16>, vector<16x32xbf16>, vector<8x32xf32> -> vector<8x32xf32>
    %28 = arith.addf %11, %27 : vector<8x32xf32>
    %c1_i32 = arith.constant 1 : i32
    %29 = arith.truncf %28 : vector<8x32xf32> to vector<8x32xbf16>
    %cst_15 = arith.constant dense<0.000000e+00> : vector<8x16xf32>
    %30 = tpu.matmul %29, %10, %cst_15 {dimension_numbers = #tpu.dot_dimension_numbers<[1], [1], [0], [0], [0, 0, 1, 0], [], []>} : vector<8x32xbf16>, vector<16x32xbf16>, vector<8x16xf32> -> vector<8x16xf32>
    %cst_16 = arith.constant 0.176776692 : f32
    %31 = vector.broadcast %cst_16 : f32 to vector<8x16xf32>
    %32 = arith.mulf %30, %31 : vector<8x16xf32>
    %cst_17 = arith.constant dense<0xFF800000> : vector<8xf32>
    %33 = vector.multi_reduction <maximumf>, %32, %cst_17 [1] : vector<8x16xf32> to vector<8xf32>
    %34 = vector.shape_cast %33 : vector<8xf32> to vector<8x1xf32>
    %35 = vector.broadcast %34 : vector<8x1xf32> to vector<8x16xf32>
    %36 = arith.subf %32, %35 : vector<8x16xf32>
    %37 = math.exp %36 : vector<8x16xf32>
    %cst_18 = arith.constant dense<0.000000e+00> : vector<8xf32>
    %38 = vector.multi_reduction <add>, %37, %cst_18 [1] : vector<8x16xf32> to vector<8xf32>
    %39 = vector.shape_cast %38 : vector<8xf32> to vector<8x1xf32>
    %40 = tpu.reciprocal %39 {approx = true} : vector<8x1xf32> -> vector<8x1xf32>
    %41 = vector.broadcast %40 : vector<8x1xf32> to vector<8x16xf32>
    %42 = arith.mulf %37, %41 : vector<8x16xf32>
    %43 = arith.truncf %42 : vector<8x16xf32> to vector<8x16xbf16>
    %cst_19 = arith.constant dense<0.000000e+00> : vector<8x32xf32>
    %44 = tpu.matmul %43, %10, %cst_19 {dimension_numbers = #tpu.dot_dimension_numbers<[1], [0], [0], [1], [0, 0, 1, 1], [], []>} : vector<8x16xbf16>, vector<16x32xbf16>, vector<8x32xf32> -> vector<8x32xf32>
    %45 = arith.addf %28, %44 : vector<8x32xf32>
    %46 = arith.truncf %45 : vector<8x32xf32> to vector<8x32xbf16>
    %c0_20 = arith.constant 0 : index
    %c0_21 = arith.constant 0 : index
    %47 = vector.load %arg6[%c0_20, %c0_21] : memref<32x128xbf16, #tpu.memory_space<vmem>>, vector<32x128xbf16>
    %cst_22 = arith.constant dense<0.000000e+00> : vector<8x128xf32>
    %48 = tpu.matmul %46, %47, %cst_22 {dimension_numbers = #tpu.dot_dimension_numbers<[1], [0], [0], [1], [0, 0, 1, 1], [], []>} : vector<8x32xbf16>, vector<32x128xbf16>, vector<8x128xf32> -> vector<8x128xf32>
    %c0_23 = arith.constant 0 : index
    %c0_24 = arith.constant 0 : index
    %49 = vector.load %arg7[%c0_23, %c0_24] : memref<1x128xf32, #tpu.memory_space<vmem>>, vector<1x128xf32>
    %50 = vector.broadcast %49 : vector<1x128xf32> to vector<8x128xf32>
    %51 = arith.addf %48, %50 : vector<8x128xf32>
    %c0_25 = arith.constant 0 : index
    %c0_26 = arith.constant 0 : index
    %52 = vector.load %arg8[%c0_25, %c0_26] : memref<32x32xbf16, #tpu.memory_space<vmem>>, vector<32x32xbf16>
    %cst_27 = arith.constant dense<0.000000e+00> : vector<8x32xf32>
    %53 = tpu.matmul %46, %52, %cst_27 {dimension_numbers = #tpu.dot_dimension_numbers<[1], [0], [0], [1], [0, 0, 1, 1], [], []>} : vector<8x32xbf16>, vector<32x32xbf16>, vector<8x32xf32> -> vector<8x32xf32>
    %c0_28 = arith.constant 0 : index
    %c0_29 = arith.constant 0 : index
    %54 = vector.load %arg9[%c0_28, %c0_29] : memref<1x32xf32, #tpu.memory_space<vmem>>, vector<1x32xf32>
    %55 = vector.broadcast %54 : vector<1x32xf32> to vector<8x32xf32>
    %56 = arith.addf %53, %55 : vector<8x32xf32>
    %cst_30 = arith.constant 0.000000e+00 : f32
    %57 = vector.broadcast %cst_30 : f32 to vector<8x32xf32>
    %58 = arith.maximumf %56, %57 : vector<8x32xf32>
    %59 = arith.truncf %58 : vector<8x32xf32> to vector<8x32xbf16>
    %c0_31 = arith.constant 0 : index
    %c0_32 = arith.constant 0 : index
    %60 = vector.load %arg10[%c0_31, %c0_32] : memref<32x32xbf16, #tpu.memory_space<vmem>>, vector<32x32xbf16>
    %cst_33 = arith.constant dense<0.000000e+00> : vector<8x32xf32>
    %61 = tpu.matmul %59, %60, %cst_33 {dimension_numbers = #tpu.dot_dimension_numbers<[1], [0], [0], [1], [0, 0, 1, 1], [], []>} : vector<8x32xbf16>, vector<32x32xbf16>, vector<8x32xf32> -> vector<8x32xf32>
    %c0_34 = arith.constant 0 : index
    %c0_35 = arith.constant 0 : index
    %62 = vector.load %arg11[%c0_34, %c0_35] : memref<1x32xf32, #tpu.memory_space<vmem>>, vector<1x32xf32>
    %63 = vector.broadcast %62 : vector<1x32xf32> to vector<8x32xf32>
    %64 = arith.addf %61, %63 : vector<8x32xf32>
    %cst_36 = arith.constant 0.000000e+00 : f32
    %65 = vector.broadcast %cst_36 : f32 to vector<8x32xf32>
    %66 = arith.maximumf %64, %65 : vector<8x32xf32>
    %67 = arith.truncf %66 : vector<8x32xf32> to vector<8x32xbf16>
    %c0_37 = arith.constant 0 : index
    %c0_38 = arith.constant 0 : index
    %68 = vector.load %arg12[%c0_37, %c0_38] : memref<32x128xbf16, #tpu.memory_space<vmem>>, vector<32x128xbf16>
    %cst_39 = arith.constant dense<0.000000e+00> : vector<8x128xf32>
    %69 = tpu.matmul %67, %68, %cst_39 {dimension_numbers = #tpu.dot_dimension_numbers<[1], [0], [0], [1], [0, 0, 1, 1], [], []>} : vector<8x32xbf16>, vector<32x128xbf16>, vector<8x128xf32> -> vector<8x128xf32>
    %c0_40 = arith.constant 0 : index
    %c0_41 = arith.constant 0 : index
    %70 = vector.load %arg13[%c0_40, %c0_41] : memref<1x128xf32, #tpu.memory_space<vmem>>, vector<1x128xf32>
    %71 = vector.broadcast %70 : vector<1x128xf32> to vector<8x128xf32>
    %72 = arith.addf %69, %71 : vector<8x128xf32>
    %73 = arith.negf %72 : vector<8x128xf32>
    %74 = math.exp %73 : vector<8x128xf32>
    %cst_42 = arith.constant 1.000000e+00 : f32
    %75 = vector.broadcast %cst_42 : f32 to vector<8x128xf32>
    %76 = arith.addf %75, %74 : vector<8x128xf32>
    %77 = arith.divf %75, %76 : vector<8x128xf32>
    %78 = tpu.iota {dimensions = array<i32: 1>} : vector<8x128xi32>
    %c4_i32 = arith.constant 4 : i32
    %79 = vector.broadcast %c4_i32 : i32 to vector<8x128xi32>
    %80 = arith.cmpi slt, %78, %79 : vector<8x128xi32>
    %81 = arith.select %80, %51, %77 : vector<8x128xi1>, vector<8x128xf32>
    %c0_43 = arith.constant 0 : index
    %c0_44 = arith.constant 0 : index
    %c0_45 = arith.constant 0 : index
    %82 = vector.load %arg14[%c0_43, %c0_44, %c0_45] : memref<1x8x128xf32, #tpu.memory_space<vmem>>, vector<1x8x128xf32>
    %83 = vector.shape_cast %82 : vector<1x8x128xf32> to vector<8x128xf32>
    %84 = vector.shape_cast %81 : vector<8x128xf32> to vector<1x8x128xf32>
    tpu.vector_store %arg14[%c0_43, %c0_44, %c0_45], %84 {strides = array<i32>} : memref<1x8x128xf32, #tpu.memory_space<vmem>>, vector<1x8x128xf32>,
    return
  }
  func.func @transform_0(%arg0: i32) -> (i32, i32, i32) {
    %c0_i32 = arith.constant 0 : i32
    %c0_i32_0 = arith.constant 0 : i32
    %c0_i32_1 = arith.constant 0 : i32
    return %arg0, %c0_i32, %c0_i32_0 : i32, i32, i32
  }
  func.func @transform_1(%arg0: i32) -> (i32, i32) {
    %c0_i32 = arith.constant 0 : i32
    %c0_i32_0 = arith.constant 0 : i32
    %c0_i32_1 = arith.constant 0 : i32
    return %c0_i32, %c0_i32_0 : i32, i32
  }
  func.func @transform_2(%arg0: i32) -> (i32, i32) {
    %c0_i32 = arith.constant 0 : i32
    %c0_i32_0 = arith.constant 0 : i32
    %c0_i32_1 = arith.constant 0 : i32
    return %c0_i32, %c0_i32_0 : i32, i32
  }
  func.func @transform_3(%arg0: i32) -> (i32, i32) {
    %c0_i32 = arith.constant 0 : i32
    %c0_i32_0 = arith.constant 0 : i32
    %c0_i32_1 = arith.constant 0 : i32
    return %c0_i32, %c0_i32_0 : i32, i32
  }
  func.func @transform_4(%arg0: i32) -> (i32, i32) {
    %c0_i32 = arith.constant 0 : i32
    %c0_i32_0 = arith.constant 0 : i32
    %c0_i32_1 = arith.constant 0 : i32
    return %c0_i32, %c0_i32_0 : i32, i32
  }
  func.func @transform_5(%arg0: i32) -> (i32, i32) {
    %c0_i32 = arith.constant 0 : i32
    %c0_i32_0 = arith.constant 0 : i32
    %c0_i32_1 = arith.constant 0 : i32
    return %c0_i32, %c0_i32_0 : i32, i32
  }
  func.func @transform_6(%arg0: i32) -> (i32, i32) {
    %c0_i32 = arith.constant 0 : i32
    %c0_i32_0 = arith.constant 0 : i32
    %c0_i32_1 = arith.constant 0 : i32
    return %c0_i32, %c0_i32_0 : i32, i32
  }
  func.func @transform_7(%arg0: i32) -> (i32, i32) {
    %c0_i32 = arith.constant 0 : i32
    %c0_i32_0 = arith.constant 0 : i32
    %c0_i32_1 = arith.constant 0 : i32
    return %c0_i32, %c0_i32_0 : i32, i32
  }
  func.func @transform_8(%arg0: i32) -> (i32, i32) {
    %c0_i32 = arith.constant 0 : i32
    %c0_i32_0 = arith.constant 0 : i32
    %c0_i32_1 = arith.constant 0 : i32
    return %c0_i32, %c0_i32_0 : i32, i32
  }
  func.func @transform_9(%arg0: i32) -> (i32, i32) {
    %c0_i32 = arith.constant 0 : i32
    %c0_i32_0 = arith.constant 0 : i32
    %c0_i32_1 = arith.constant 0 : i32
    return %c0_i32, %c0_i32_0 : i32, i32
  }
  func.func @transform_10(%arg0: i32) -> (i32, i32) {
    %c0_i32 = arith.constant 0 : i32
    %c0_i32_0 = arith.constant 0 : i32
    %c0_i32_1 = arith.constant 0 : i32
    return %c0_i32, %c0_i32_0 : i32, i32
  }
  func.func @transform_11(%arg0: i32) -> (i32, i32) {
    %c0_i32 = arith.constant 0 : i32
    %c0_i32_0 = arith.constant 0 : i32
    %c0_i32_1 = arith.constant 0 : i32
    return %c0_i32, %c0_i32_0 : i32, i32
  }
  func.func @transform_12(%arg0: i32) -> (i32, i32) {
    %c0_i32 = arith.constant 0 : i32
    %c0_i32_0 = arith.constant 0 : i32
    %c0_i32_1 = arith.constant 0 : i32
    return %c0_i32, %c0_i32_0 : i32, i32
  }
  func.func @transform_13(%arg0: i32) -> (i32, i32, i32) {
    %c0_i32 = arith.constant 0 : i32
    %c0_i32_0 = arith.constant 0 : i32
    %c0_i32_1 = arith.constant 0 : i32
    return %arg0, %c0_i32, %c0_i32_0 : i32, i32, i32
  }
}

</mosaic_0001>

<bundles_post_ra>
// kernel: tpu_custom_call.1
= control target key start
LH: loop header
LB: loop body
LE: loop exit
PB: predicated region body
PF: predicated region fallthrough
CT: control target
= control target key end

     0   :  { %s1761_s0 = inlined_call_operand.vmem [shape: f32[2,16,4], index: 0, kind: input, shape index: {}]   ;;  %s1762_s1 = inlined_call_operand.vmem [shape: f32[16,32], index: 1, kind: input, shape index: {}]   ;;  %s1763_s2 = inlined_call_operand.hbm [shape: bf16[4,32], index: 2, kind: input, shape index: {}]   ;;  %s1764_s3 = inlined_call_operand.hbm [shape: f32[1,32], index: 3, kind: input, shape index: {}]   ;;  %s1765_s4 = inlined_call_operand.hbm [shape: f32[8,32], index: 4, kind: input, shape index: {}]   ;;  %s1766_s5 = inlined_call_operand.vmem [shape: bf16[32,128], index: 5, kind: input, shape index: {}]   ;;  %s1767_s6 = inlined_call_operand.hbm [shape: f32[1,128], index: 6, kind: input, shape index: {}]   ;;  %s1768_s7 = inlined_call_operand.hbm [shape: bf16[32,32], index: 7, kind: input, shape index: {}]   ;;  %s1769_s8 = inlined_call_operand.hbm [shape: f32[1,32], index: 8, kind: input, shape index: {}]   ;;  %s1770_s9 = inlined_call_operand.vmem [shape: bf16[32,32], index: 9, kind: input, shape index: {}]   ;;  %s1771_s10 = inlined_call_operand.vmem [shape: f32[1,32], index: 10, kind: input, shape index: {}]   ;;  %s1772_s11 = inlined_call_operand.hbm [shape: bf16[32,128], index: 11, kind: input, shape index: {}]   ;;  %s1773_s12 = inlined_call_operand.vmem [shape: f32[1,128], index: 12, kind: input, shape index: {}]   ;;  %s1774_s13 = inlined_call_operand.hbm [shape: f32[2,8,128], index: 13, kind: output, shape index: {}]  }
   0x1   :  { %1780 = sst [smem:[#allocation25_spill]] %s1764_s3 }
   0x2   :  { %1781 = sst [smem:[#allocation26_spill]] %s1767_s6 }
   0x3   :  { %1782 = sst [smem:[#allocation27_spill]] %s1769_s8 }
   0x4   :  { %18 = vsyncpa [#allocation3], 0 }
   0x5   :  { %19 = vsyncpa [#allocation6], 0 }
   0x6   :  { %20 = vsyncpa [#allocation9], 0 }
   0x7   :  { %21 = vsyncpa [#allocation12], 0 }
   0x8   :  { %22 = vsyncpa [#allocation4], 0 }
   0x9   :  { %24 = vsyncpa [#allocation4 + $0x1], 0  ;;  %s1569_s25 = smov 0   ;;  %s1571_s26 = smov 0  }
   0xa   :  { %s1573_s27 = smov 0   ;;  %s1575_s28 = smov 0  }
   0xb LB: > { %1783 = sst [smem:[#allocation20_spill]] %s1476_s25  ;;  %s1590_s29 = sadd.s32 4294967295, %s1488_s28   ;;  %s1488_s28 = sphi %s1575_s28, %s1797_s28   ;;  %s1484_s27 = sphi %s1573_s27, %s1799_s27   ;;  %s1480_s26 = sphi %s1571_s26, %s1801_s26   ;;  %s1476_s25 = sphi %s1569_s25, %s1800_s25  }
   0xc   : > { %1784 = sst [smem:[#allocation21_spill]] %s1484_s27  ;;  %s995_s30 = sadd.s32 4294967294, %s1488_s28  }
   0xd   : > { %s1594_s14 = sadd.s32 1, %s1488_s28   ;;  %s315_s15 = sadd.s32 1, %s1484_s27 }
   0xe   : > { %1785 = sst [smem:[#allocation22_spill]] %s1594_s14  ;;  %s312_s16 = ssub.s32 %s1488_s28, %s1594_s14 }
   0xf   : > { %p325_p0 = scmp.ne.s32.totalorder %s1484_s27, %s1480_s26  ;;  %p313_p1 = scmp.eq.s32.totalorder %s312_s16, 0 }
  0x10   : > { %p326_p2 = scmp.eq.s32.totalorder %s1590_s29, 1  ;;  %p331_p3 = scmp.ne.s32.totalorder %s1480_s26, %s1476_s25 }
  0x11   : > { %p332_p4 = scmp.eq.s32.totalorder %s995_s30, 1  ;;  %p996_p7 = scmp.ge.s32.totalorder %s1488_s28, 1 }
  0x12   : > { %s1605_s17 = scalar_select %p313_p1, %s1484_s27, %s315_s15  }
  0x13   : > { %p1607_p5 = por %p326_p2, %p325_p0  ;;  %p1611_p6 = por %p332_p4, %p331_p3 }
  0x14   : > { %1786 = sst [smem:[#allocation23_spill]] %s1605_s17  ;;  %p339_p8 = scmp.lt.s32.totalorder %s1488_s28, 3 }
  0x15   : > { %s1788_s19 = scalar_select %p1611_p6, 1, 0 }
  0x16   : > { %p1127_p9 = scmp.eq.s32.totalorder %s1590_s29, 0  ;;  %p1618_p10 = pnand %p996_p7, %p339_p8 }
  0x17   : > { %1789 = sst [smem:[#allocation24_spill]] %s1788_s19  ;;  %s1490_s24 = smov [#allocation5]  }
  0x18   : > { %s1791_s3 = sld [smem:[#allocation25_spill]]  ;;  %p1101_p11 = pneg %p1618_p10 }
  0x19   : > { %s368_s30 = sshll.u32 %s1490_s24, 4  ;;  %s1792_s6 = sld [smem:[#allocation26_spill]]  ;;  %s369_s30 = int_to_ptr.vmem [resolvable:$true] %s368_s30 }
  0x1a   : > { %p1632_p12 = pnand %p1127_p9, %p1101_p11  ;;  %s1794_s8 = sld [smem:[#allocation27_spill]] }
  0x1b   : > { %s1491_s14 = smov [#allocation8]   ;;  %s1492_s19 = smov [#allocation11]  }
  0x1c   : > { %s395_s24 = sshll.u32 %s1491_s14, 4  ;;  %s421_s25 = sshll.u32 %s1492_s19, 4  ;;  %s396_s24 = int_to_ptr.vmem [resolvable:$true] %s395_s24  ;;  %s422_s25 = int_to_ptr.vmem [resolvable:$true] %s421_s25 }
  0x1d   : > { %s1493_s21 = smov [#allocation2]   ;;  %s1494_s19 = smov [#allocation7]  }
  0x1e   : > { %s366_s23 = sshll.u32 %s1791_s3, 4  ;;  %s356_s14 = sshll.u32 %s1493_s21, 4  ;;  %s367_s23 = int_to_ptr.hbm [resolvable:$true] %s366_s23  ;;  %s357_s14 = int_to_ptr.vmem [resolvable:$true] %s356_s14 }
  0x1f   : > { %s393_s17 = sshll.u32 %s1792_s6, 4  ;;  %s354_s6 = sshll.u32 %s1763_s2, 4  ;;  %s394_s17 = int_to_ptr.hbm [resolvable:$true] %s393_s17  ;;  %s355_s6 = int_to_ptr.hbm [resolvable:$true] %s354_s6 }
  0x20   : > { %s419_s3 = sshll.u32 %s1794_s8, 4  ;;  %s380_s15 = sshll.u32 %s1494_s19, 4  ;;  %s420_s3 = int_to_ptr.hbm [resolvable:$true] %s419_s3  ;;  %s381_s15 = int_to_ptr.vmem [resolvable:$true] %s380_s15 }
  0x21   : > { %1107 = dma.hbm_to_vmem [thread:$0]  (!%p1632_p12), %s367_s23, 16, %s369_s30, [#allocation6]  }
  0x22   : > { %1113 = dma.hbm_to_vmem [thread:$0]  (!%p1632_p12), %s394_s17, 16, %s396_s24, [#allocation9]  }
  0x23   : > { %1119 = dma.hbm_to_vmem [thread:$0]  (!%p1632_p12), %s420_s3, 16, %s422_s25, [#allocation12]  }
  0x24   : > { %s378_s23 = sshll.u32 %s1765_s4, 4  ;;  %s404_s24 = sshll.u32 %s1768_s7, 4  ;;  %s379_s23 = int_to_ptr.hbm [resolvable:$true] %s378_s23  ;;  %s405_s24 = int_to_ptr.hbm [resolvable:$true] %s404_s24 }
  0x25   : > { %1104 = dma.hbm_to_vmem [thread:$0]  (!%p1632_p12), %s355_s6, 32, %s357_s14, [#allocation3]  }
  0x26   : > { %1110 = dma.hbm_to_vmem [thread:$0]  (!%p1632_p12), %s379_s23, 128, %s381_s15, [#allocation6]  }
  0x27   : > { %s1495_s3 = smov [#allocation10]   ;;  %s1496_s8 = smov 64  }
  0x28   : > { %s406_s25 = sshll.u32 %s1495_s3, 4  ;;  %s1497_s16 = smov 4   ;;  %s407_s25 = int_to_ptr.vmem [resolvable:$true] %s406_s25 }
  0x29   : > { %1116 = dma.hbm_to_vmem [thread:$0]  (!%p1632_p12), %s405_s24, 256, %s407_s25, [#allocation9], %s1496_s8, %s1496_s8, %s1497_s16  }
  0x2a   : > { %s436_s14 = sshll.u32 %s1772_s11, 4  ;;  %s1498_s22 = smov [#allocation13]   ;;  %s437_s14 = int_to_ptr.hbm [resolvable:$true] %s436_s14 }
  0x2b   : > { %s438_s17 = sshll.u32 %s1498_s22, 4  ;;  %465 = sbr.rel (%p1618_p10) target bundleno = 1682 (0x692), region = 72  ;;  %s439_s17 = int_to_ptr.vmem [resolvable:$true] %s438_s17 }
  0x2c   : > { %1122 = dma.hbm_to_vmem [thread:$0]  (!%p1632_p12), %s437_s14, 256, %s439_s17, [#allocation12], %s1496_s8, %s1496_s8, %s1497_s16  }
  0x30   : > { %1455 = dma.done.wait (%p1127_p9), [#allocation3], 32  }
  0x31   : > { %1457 = vsyncadd (%p1127_p9), [#allocation3], 4294967264 }
  0x32   : > { %1459 = dma.done.wait (%p1127_p9), [#allocation6], 144  }
  0x33   : > { %1461 = vsyncadd (%p1127_p9), [#allocation6], 4294967152 }
  0x34   : > { %1463 = dma.done.wait (%p1127_p9), [#allocation9], 272  }
  0x35   : > { %1465 = vsyncadd (%p1127_p9), [#allocation9], 4294967024 }
  0x36   : > { %1467 = dma.done.wait (%p1127_p9), [#allocation12], 272  }
  0x37   : > { %1469 = vsyncadd (%p1127_p9), [#allocation12], 4294967024  ;;  %p540_p13 = scmp.lt.s32.totalorder %s1590_s29, 1  ;;  %vm558_vm0 = vcmask 1041408   ;;  %v549_v0 = vld [vmem:[#allocation2] sm:$0x3] }
  0x38   : > { %v560_v3 = vsel %vm558_vm0, %v549_v0, 0  ;;  %vm554_vm1 = vcmask 31744   ;;  %v1183_v6 = vld [vmem:[#allocation5] ss:$0 sm:$0xff]  ;;  %v577_v10 = vld [vmem:[%s1762_s1 + $0x8] sm:$0xff]  ;;  %vm583_vm2 = vcmask 261120  }
  0x39   : > { %s541_s27 = scalar_select %p540_p13, %s1590_s29, 1  ;;  %569 = vmatpush.bf16.msra.mxu0 %v560_v3  ;;  %v576_v8 = vld [vmem:[%s1762_s1] sm:$0xff]  ;;  %vm604_vm3 = vcmask 130048   ;;  %v1066_v44 = vld [vmem:[#allocation10 + $0x8] sm:$0xff]  ;;  %v1064_v45 = vld [vmem:[%s1766_s5 + $0x8] sm:$0xff] }
  0x3a   : > { %v581_v16 = vld [vmem:[#allocation7] sm:$0xff]  ;;  %v1065_v46 = vld [vmem:[#allocation10] sm:$0xff]  ;;  %v1184_v60 = vld [vmem:[#allocation11] ss:$0 sm:$0xff]  ;;  %s537_s19 = sand.u32 1, %s1480_s26   ;;  %s1059_s3 = sshll.u32 %s1590_s29, 3 }
  0x3b   : > { %s1062_s20 = sshll.u32 %s541_s27, 4  ;;  %v582_v17 = vpack.c.bf16 %v581_v16, %v581_v16  ;;  %v1063_v51 = vld [vmem:[%s1766_s5] sm:$0xff]  ;;  %v1068_v52 = vld [vmem:[%s1770_s9 + $0x8] sm:$0xff]  ;;  %s1013_s15 = sshll.u32 %s537_s19, 3 }
  0x3c   : > { %s544_s24 = scalar_lea.vmem %s1761_s0, %s1062_s20  ;;  %v1067_v53 = vld [vmem:[%s1770_s9] sm:$0xff]  ;;  %v1070_v58 = vld [vmem:[#allocation13 + $0x8] sm:$0xff]  ;;  %s862_s16 = scalar_lea.hbm %s1774_s13, %s1059_s3 }
  0x3d   : > { %v546_v1 = vld [vmem:[%s544_s24] sm:$0xff]  ;;  %v547_v2 = vld [vmem:[%s544_s24 + $0x8] sm:$0xff]  ;;  %s539_s21 = scalar_lea.vmem [#allocation14], %s1013_s15  ;;  %s866_s14 = sshll.u32 %s862_s16, 4  ;;  %s867_s14 = int_to_ptr.hbm [resolvable:$true] %s866_s14 }
  0x3e   : > { %v548_v4 = vpack.c.bf16 %v547_v2, %v546_v1  ;;  %v1069_v59 = vld [vmem:[#allocation13] sm:$0xff]  ;;  %s864_s6 = sshll.u32 %s539_s21, 4  ;;  %s852_s29 = scalar_lea.sflag [#allocation4], %s537_s19  ;;  %s865_s6 = int_to_ptr.vmem [resolvable:$true] %s864_s6 }
  0x3f   : > { %s1424_s22 = sshra.s32 %s867_s14, 4  ;;  %s1430_s23 = scalar_lea.hbm %s1774_s13, 16  ;;  %s1425_s22 = int_to_ptr.hbm [resolvable:$true] %s1424_s22 }
  0x40   : > { %1016 = vmatmul.msk.bf16.vlgmr.msra.gmra.mxu0 %vm554_vm1, %v548_v4  ;;  %v1186_v4 = vld [vmem:[%s1771_s10] ss:$0 sm:$0xff]  ;;  %s1426_s17 = scalar_lea.hbm %s1425_s22, 8  ;;  %p1431_p3 = scmp.lt.s32.totalorder %s1425_s22, %s1774_s13 }
  0x41   : > { %p1427_p0 = scmp.ne.s32.totalorder %s1425_s22, %s1426_s17  ;;  %p1432_p4 = scmp.lt.s32.totalorder %s1430_s23, %s1426_s17 }
  0x43   : > { %p1428_p1 = pnand %p1427_p0, %p1607_p5  ;;  %p1433_p7 = por %p1432_p4, %p1431_p3 }
  0x45   : > { %p1429_p2 = pneg %p1428_p1 }
  0x47   : > { %p1434_p8 = pnand %p1433_p7, %p1429_p2 }
  0xbd   : > { %v571_v5 = vpop.f32.mrf.mxu0 }
  0xbe   : > { %v572_v7 = vadd.f32 %v1183_v6, %v571_v5 }
  0xc0   : > { %v578_v12 = vadd.f32 %v576_v8, %v572_v7 }
  0xc5   : > { %v573_v9 = vpop.f32.mrf.mxu0 }
  0xc6   : > { %v574_v11 = vadd.f32 %v1183_v6, %v573_v9 }
  0xc8   : > { %v579_v13 = vadd.f32 %v577_v10, %v574_v11  ;;  %v1187_v10 = vld [vmem:[%s1773_s12] ss:$0 sm:$0xff] }
  0xca   : > { %v580_v14 = vpack.c.bf16 %v579_v13, %v578_v12 }
  0xcc   : > { %627 = vmatpush.bf16.msra.mxu2 %v580_v14  ;;  %674 = vmatpush.bf16.msrb.mxu0 %v580_v14  ;;  %v588_v15 = vsel %vm583_vm2, %v580_v14, 0 }
  0xcd   : > { %597 = vmatpush.bf16.xpose.msra.mxu1 %v588_v15  ;;  %645 = vmatpush.bf16.xpose.msra.mxu3 %v588_v15 }
  0xd0   : > { %711 = vmatpush.bf16.msrb.mxu2 %v1064_v45  ;;  %820 = vmatpush.bf16.msra.mxu0 %v1070_v58 }
  0xd4   : > { %1017 = vmatmul.msk.bf16.vlgmr.msra.gmra.mxu1 %vm583_vm2, %v582_v17  ;;  %712 = vmatpush.bf16.msrb.mxu2 %v1063_v51 }
  0xd5   : > { %744 = vmatpush.bf16.msrb.mxu1 %v1066_v44  ;;  %782 = vmatpush.bf16.msrb.mxu3 %v1068_v52 }
  0xd6   : > { %821 = vmatpush.bf16.msra.mxu0 %v1069_v59 }
  0xd9   : > { %745 = vmatpush.bf16.msrb.mxu1 %v1065_v46  ;;  %783 = vmatpush.bf16.msrb.mxu3 %v1067_v53 }
 0x151   : > { %v599_v18 = vpop.f32.mrf.mxu1 }
 0x152   : > { %v603_v19 = vmul.f32 0.17677669, %v599_v18  ;;  %v846_v18 = vlaneseq }
 0x154   : > { %v605_v20 = vsel %vm604_vm3, %v603_v19, -inf }
 0x155   : > { %606 = vmax.xlane.f32.xlu0 %v605_v20 }
 0x159   : > { %v601_v21 = vpop.f32.mrf.mxu1 }
 0x1c8   : > { %v607_v22 = vpop.xlane.xlu0 %606 }
 0x1c9   : > { %v608_v23 = vsub.f32 %v603_v19, %v607_v22  ;;  %v847_v22 = vand.u32 127, %v846_v18 }
 0x1cb   : > { %v609_v24 = vmul.f32 1.442695, %v608_v23  ;;  %v1185_v23 = vld [vmem:[#allocation8] ss:$0 sm:$0xff]  ;;  %vm848_vm7 = vcmp.lt.s32.totalorder %v847_v22, 4 }
 0x1cd   : > { %1188 = vpow2.f32 %v609_v24 }
 0x1d3   : > { %v1189_v25 = vpop.eup %1188 }
 0x1d4   : > { %v611_v26 = vsel %vm604_vm3, %v1189_v25, 0.0 }
 0x1d5   : > { %612 = vadd.xlane.f32.xlu0 %v611_v26 }
 0x248   : > { %v613_v27 = vpop.xlane.xlu0 %612 }
 0x249   : > { %1190 = vrcp.f32 %v613_v27 }
 0x24f   : > { %v1191_v28 = vpop.eup %1190 }
 0x250   : > { %v615_v29 = vmul.f32 %v1191_v28, %v1189_v25 }
 0x252   : > { %v616_v30 = vpack.c.bf16 %v615_v29, %v615_v29 }
 0x254   : > { %1018 = vmatmul.msk.bf16.vlgmr.msra.gmra.mxu2 %vm604_vm3, %v616_v30 }
 0x2d7   : > { %v629_v31 = vpop.f32.mrf.mxu2 }
 0x2d8   : > { %v633_v32 = vadd.f32 %v629_v31, %v581_v16 }
 0x2da   : > { %v634_v33 = vpack.c.bf16 %v633_v32, %v633_v32 }
 0x2dc   : > { %1019 = vmatmul.msk.bf16.vlgmr.msra.gmra.mxu3 %vm583_vm2, %v634_v33 }
 0x2df   : > { %v631_v34 = vpop.f32.mrf.mxu2 }
 0x35f   : > { %v647_v35 = vpop.f32.mrf.mxu3 }
 0x360   : > { %v651_v36 = vmul.f32 0.17677669, %v647_v35 }
 0x362   : > { %v652_v37 = vsel %vm604_vm3, %v651_v36, -inf }
 0x363   : > { %653 = vmax.xlane.f32.xlu1 %v652_v37 }
 0x367   : > { %v649_v38 = vpop.f32.mrf.mxu3 }
 0x3d6   : > { %v654_v39 = vpop.xlane.xlu1 %653 }
 0x3d7   : > { %v655_v40 = vsub.f32 %v651_v36, %v654_v39 }
 0x3d9   : > { %v656_v41 = vmul.f32 1.442695, %v655_v40 }
 0x3db   : > { %1192 = vpow2.f32 %v656_v41 }
 0x3e1   : > { %v1193_v42 = vpop.eup %1192 }
 0x3e2   : > { %v658_v43 = vsel %vm604_vm3, %v1193_v42, 0.0 }
 0x3e3   : > { %659 = vadd.xlane.f32.xlu1 %v658_v43 }
 0x456   : > { %v660_v47 = vpop.xlane.xlu1 %659 }
 0x457   : > { %1194 = vrcp.f32 %v660_v47 }
 0x45d   : > { %v1195_v48 = vpop.eup %1194 }
 0x45e   : > { %v662_v49 = vmul.f32 %v1195_v48, %v1193_v42 }
 0x460   : > { %v663_v50 = vpack.c.bf16 %v662_v49, %v662_v49 }
 0x462   : > { %1020 = vmatmul.msk.bf16.vlgmr.msrb.gmra.mxu0 %vm604_vm3, %v663_v50 }
 0x4df   : > { %v676_v54 = vpop.f32.mrf.mxu0 }
 0x4e0   : > { %v680_v55 = vadd.f32 %v676_v54, %v633_v32 }
 0x4e2   : > { %v681_v56 = vpack.c.bf16 %v680_v55, %v680_v55 }
 0x4e4   : > { %1029 = vmatmul.msk.bf16.vlgmr.msrb.gmra.mxu2 %vm583_vm2, %v681_v56  ;;  %1038 = vmatmul.msk.bf16.vlgmr.msrb.gmra.mxu1 %vm583_vm2, %v681_v56 }
 0x4e7   : > { %v678_v57 = vpop.f32.mrf.mxu0 }
 0x561   : > { %v747_v61 = vpop.f32.mrf.mxu1 }
 0x562   : > { %v748_v62 = vadd.f32 %v1184_v60, %v747_v61 }
 0x564   : > { %v751_v63 = vmax.f32 %v748_v62, 0.0 }
 0x566   : > { %v752_v0 = vpack.c.bf16 %v751_v63, %v751_v63 }
 0x567   : > { %v714_v1 = vpop.f32.mrf.mxu2 }
 0x568   : > { %1047 = vmatmul.msk.bf16.vlgmr.msrb.gmra.mxu3 %vm583_vm2, %v752_v0  ;;  %v715_v28 = vadd.f32 %v1185_v23, %v714_v1 }
 0x569   : > { %v749_v2 = vpop.f32.mrf.mxu1 }
 0x56f   : > { %v716_v3 = vpop.f32.mrf.mxu2 }
 0x5eb   : > { %v785_v5 = vpop.f32.mrf.mxu3 }
 0x5ec   : > { %v786_v6 = vadd.f32 %v1186_v4, %v785_v5 }
 0x5ee   : > { %v789_v7 = vmax.f32 %v786_v6, 0.0 }
 0x5f0   : > { %v790_v8 = vpack.c.bf16 %v789_v7, %v789_v7 }
 0x5f2   : > { %1056 = vmatmul.msk.bf16.vlgmr.msra.gmra.mxu0 %vm583_vm2, %v790_v8 }
 0x5f3   : > { %v787_v9 = vpop.f32.mrf.mxu3 }
 0x66f   : > { %v823_v11 = vpop.f32.mrf.mxu0 }
 0x670   : > { %v824_v12 = vadd.f32 %v1187_v10, %v823_v11 }
 0x672   : > { %v1057_v13 = vmul.f32 -1.442695, %v824_v12 }
 0x674   : > { %1196 = vpow2.f32 %v1057_v13 }
 0x677   : > { %v825_v14 = vpop.f32.mrf.mxu0 }
 0x67a   : > { %v1197_v15 = vpop.eup %1196 }
 0x67b   : > { %v830_v16 = vadd.f32 1.0, %v1197_v15 }
 0x67d   : > { %1198 = vrcp.f32 %v830_v16  ;;  %v842_v21 = vand.u32 2147483648, %v830_v16  ;;  %v840_v25 = vand.u32 2147483647, %v830_v16  ;;  %vm836_vm5 = vweird.f32 %v830_v16 }
 0x67f   : > { %v843_v27 = vor.u32 1.1754944e-38, %v842_v21  ;;  %vm841_vm8 = vcmp.eq.f32.partialorder %v840_v25, 8.507059e+37 }
 0x683   : > { %v1199_v17 = vpop.eup %1198 }
 0x684   : > { %v832_v19 = vmul.f32 %v1199_v17, %v830_v16  ;;  %vm837_vm4 = vweird.f32 %v1199_v17 }
 0x685   : > { %vm838_vm6 = vmor %vm836_vm5, %vm837_vm4 }
 0x686   : > { %v833_v20 = vsub.f32 1.0, %v832_v19 }
 0x688   : > { %v834_v24 = vmul.f32 %v1199_v17, %v833_v20 }
 0x68a   : > { %v835_v26 = vadd.f32 %v1199_v17, %v834_v24 }
 0x68c   : > { %v839_v29 = vsel %vm838_vm6, %v1199_v17, %v835_v26 }
 0x68d   : > { %v844_v30 = vsel %vm841_vm8, %v843_v27, %v839_v29 }
 0x68e   : > { %v849_v31 = vsel %vm848_vm7, %v715_v28, %v844_v30 }
 0x68f   : > { %850 = vst [vmem:[%s539_s21] sm:$0xff] %v849_v31 }
 0x690   : > { %1437 = shalt.err (!%p1434_p8)
}
 0x691   : > { %1099 = dma.vmem_to_hbm [thread:$0]  (%p1607_p5), %s865_s6, 128, %s867_s14, %s852_s29  }
 0x692 PF: > { %s1795_s19 = sld [smem:[#allocation20_spill]]  ;;  %p1141_p9 = scmp.ge.s32.totalorder %s1488_s28, 2 }
 0x694   : > { %p1124_p10 = pnand %p1141_p9, %p1611_p6 }
 0x696   : > { %p1125_p11 = pneg %p1124_p10 }
 0x698   : > { %s878_s3 = sand.u32 1, %s1795_s19  }
 0x699   : > { %s879_s25 = scalar_lea.sflag [#allocation4], %s878_s3 }
 0x69a   : > { %1471 = dma.done.wait (%p1125_p11), %s879_s25, 128  }
 0x69b   : > { %1473 = vsyncadd (%p1125_p11), %s879_s25, 4294967168  ;;  %s1797_s28 = sld [smem:[#allocation22_spill]]  ;;  %s1800_s25 = smov %s1480_s26 }
 0x69c   : > { %s1798_s8 = sld [smem:[#allocation21_spill]] }
 0x69d   : > { %s1799_s27 = sld [smem:[#allocation23_spill]] }
 0x6a1   : > { %p27_p12 = scmp.ge.s32.totalorder %s1797_s28, 4  }
 0x6a2   : > { %s1801_s26 = smov %s1798_s8 }
 0x6a3   :  { %29 = sbr.rel (!%p27_p12) target bundleno = 11 (0xb), region = 136 }
 0x6a8   :  { %885 = vsyncpa [#allocation3], 1 }
 0x6a9   :  { %887 = vsyncpa [#allocation3 + $0x1], 1 }
 0x6aa   :  { %888 = vsyncpa [#allocation6], 1 }
 0x6ab   :  { %889 = vsyncpa [#allocation9], 1 }
 0x6ac   :  { %890 = vsyncpa [#allocation12], 1 }
 0x6ad   :  { %891 = vsyncpa [#allocation4], 1 }
 0x6ae   :  { %893 = vsyncpa [#allocation4 + $0x1], 1 }

</bundles_post_ra>
